<compile_context>
chip_gen: v6e
topology: v6e:2x2x1
jax: 0.10.0
libtpu: 0.0.40
codegen_flags: <defaults>
</compile_context>

<pallas_src>
from functools import partial

import jax
import jax.numpy as jnp
from jax.experimental import pallas as pl
from jax.experimental.pallas import tpu as pltpu


def _drop_path_kernel(u_ref, x_ref, o_ref, *, keep_prob: float, scale_by_keep: bool):
    # u_ref: (TB, 1) f32 uniforms in [0, 1); x_ref/o_ref: (TB, TN) in x.dtype.
    u = u_ref[...]
    scale = 1.0 / keep_prob if (scale_by_keep and keep_prob > 0.0) else 1.0
    # (TB, 1) keep mask: `scale` with prob keep_prob, else 0. Computed in f32,
    # then cast once to x's dtype so the big multiply runs natively (bf16 VPU
    # on v6e/v7x, no f32 round-trip / doubled vreg pressure).
    keep = jnp.where(u < jnp.float32(keep_prob), jnp.float32(scale), jnp.float32(0.0))
    o_ref[...] = x_ref[...] * keep.astype(x_ref.dtype)


def _choose_tiles(B: int, N: int, itemsize: int, target_bytes: int = 2 * 1024 * 1024):
    """Pick a (TB, TN) block ~target_bytes large, lane-dense and (8,128)-legal.

    ~2 MiB tiles keep the (in + out) double-buffered footprint (~8 MiB) under
    the smallest default scoped-VMEM budget (v5e: 16 MiB, v7x: 32 MiB) while
    being large enough to hide the per-grid-step overhead on all generations.
    """
    if N % 128 == 0:
        tn = (target_bytes // (8 * itemsize)) // 128 * 128
        TN = int(min(N, max(128, tn)))
    else:
        # Non-128-aligned flattened dim: full extent is always a legal block.
        TN = int(N)
    rows = max(1, target_bytes // max(1, TN * itemsize))
    if rows >= B or B <= 8:
        TB = int(B)  # full batch extent (always legal)
    else:
        TB = int(max(8, min((rows // 8) * 8, (B // 8) * 8)))
    return TB, TN


def drop_path(
    x: jax.Array,
    key: jax.Array,
    drop_prob: float = 0.0,
    scale_by_keep: bool = True,
    training: bool = True,
) -> jax.Array:
    """DropPath forward. x: (B, ...) -- per-sample stochastic depth."""
    if drop_prob == 0.0 or not training:
        return x

    keep_prob = 1.0 - drop_prob
    orig_shape = x.shape
    B = orig_shape[0]
    N = 1
    for d in orig_shape[1:]:
        N *= int(d)

    # Flatten non-batch dims -> lane-dense 2D layout for the kernel.
    x2 = x.reshape(B, N)

    # Glue: per-sample uniforms; the bernoulli threshold is applied in-kernel.
    u = jax.random.uniform(key, (B, 1), dtype=jnp.float32)

    TB, TN = _choose_tiles(B, N, x.dtype.itemsize)
    grid = (pl.cdiv(B, TB), pl.cdiv(N, TN))

    kernel = partial(_drop_path_kernel, keep_prob=keep_prob, scale_by_keep=scale_by_keep)

    # NOTE: input_output_aliases={1: 0} would let the output reuse x's HBM
    # buffer, but it donates x (which callers may still need), so it is left off.
    out2 = pl.pallas_call(
        kernel,
        out_shape=jax.ShapeDtypeStruct((B, N), x.dtype),
        grid=grid,
        in_specs=[
            pl.BlockSpec((TB, 1), lambda i, j: (i, 0)),   # per-sample uniforms
            pl.BlockSpec((TB, TN), lambda i, j: (i, j)),  # x tile
        ],
        out_specs=pl.BlockSpec((TB, TN), lambda i, j: (i, j)),
        compiler_params=pltpu.CompilerParams(
            dimension_semantics=("parallel", "parallel"),  # shards across TCs on v7x
        ),
    )(u, x2)

    return out2.reshape(orig_shape)


if __name__ == "__main__":
    key = jax.random.PRNGKey(0)
    k_x, k_mask, k_x2, k_mask2 = jax.random.split(key, 4)

    # --- test 1: f32, lane-aligned (B, L, D) ViT-token-like tensor ------------
    B, L, D = 2, 8, 128
    x = jax.random.normal(k_x, (B, L, D), dtype=jnp.float32)

    drop_prob = 0.25
    keep_prob = 1.0 - drop_prob

    out = drop_path(x, k_mask, drop_prob=drop_prob, scale_by_keep=True, training=True)
    out = jax.block_until_ready(out)

    # Reference in plain JAX (same uniforms -> same mask).
    u = jax.random.uniform(k_mask, (B, 1), dtype=jnp.float32)
    mask = (u[:, 0] < keep_prob).astype(jnp.float32) / keep_prob
    ref = x * mask[:, None, None]
    assert jnp.allclose(out, ref, atol=1e-6), "f32 mismatch vs reference"

    # Eval / drop_prob=0 path is identity.
    out_eval = drop_path(x, k_mask, drop_prob=drop_prob, training=False)
    assert jnp.array_equal(out_eval, x)

    # --- test 2: bf16, non-128-aligned flattened dim (full-extent lane block) --
    B2, L2, D2 = 3, 7, 100  # N = 700, not a multiple of 128
    x_bf16 = jax.random.normal(k_x2, (B2, L2, D2), dtype=jnp.bfloat16)
    out2 = drop_path(x_bf16, k_mask2, drop_prob=drop_prob, scale_by_keep=True, training=True)
    out2 = jax.block_until_ready(out2)

    u2 = jax.random.uniform(k_mask2, (B2, 1), dtype=jnp.float32)
    mask2 = (u2[:, 0] < keep_prob).astype(jnp.float32) / keep_prob
    ref2 = x_bf16.astype(jnp.float32) * mask2[:, None, None]
    # bf16-native multiply -> allow bf16-level rounding error.
    assert jnp.allclose(out2.astype(jnp.float32), ref2, rtol=2e-2, atol=1e-2), (
        "bf16 mismatch vs reference"
    )

    print("KERNEL_OK")
</pallas_src>

<mosaic_0001>
module attributes {stable_mosaic.version = 11 : i64} {
  func.func @_drop_path_kernel(%arg0: i32, %arg1: i32, %arg2: memref<2x1xf32, #tpu.memory_space<vmem>>, %arg3: memref<2x1024xf32, #tpu.memory_space<vmem>>, %arg4: memref<2x1024xf32, #tpu.memory_space<vmem>>) attributes {dimension_semantics = [#tpu.dimension_semantics<parallel>, #tpu.dimension_semantics<parallel>], iteration_bounds = array<i64: 1, 1>, scalar_prefetch = 0 : i64, scratch_operands = 0 : i64, tpu.core_type = #tpu.core_type<tc>, window_params = [{transform_indices = @transform_0, window_bounds = array<i64: 2, 1>}, {transform_indices = @transform_1, window_bounds = array<i64: 2, 1024>}, {transform_indices = @transform_2, window_bounds = array<i64: 2, 1024>}]} {
    %c0 = arith.constant 0 : index
    %c0_0 = arith.constant 0 : index
    %0 = vector.load %arg2[%c0, %c0_0] : memref<2x1xf32, #tpu.memory_space<vmem>>, vector<2x1xf32>
    %cst = arith.constant 7.500000e-01 : f32
    %1 = vector.broadcast %cst : f32 to vector<2x1xf32>
    %2 = arith.cmpf olt, %0, %1 : vector<2x1xf32>
    %cst_1 = arith.constant 1.33333337 : f32
    %cst_2 = arith.constant 0.000000e+00 : f32
    %3 = vector.broadcast %cst_1 : f32 to vector<2x1xf32>
    %4 = vector.broadcast %cst_2 : f32 to vector<2x1xf32>
    %5 = arith.select %2, %3, %4 : vector<2x1xi1>, vector<2x1xf32>
    %c0_3 = arith.constant 0 : index
    %c0_4 = arith.constant 0 : index
    %6 = vector.load %arg3[%c0_3, %c0_4] : memref<2x1024xf32, #tpu.memory_space<vmem>>, vector<2x1024xf32>
    %7 = vector.broadcast %5 : vector<2x1xf32> to vector<2x1024xf32>
    %8 = arith.mulf %6, %7 : vector<2x1024xf32>
    %c0_5 = arith.constant 0 : index
    %c0_6 = arith.constant 0 : index
    %9 = vector.load %arg4[%c0_5, %c0_6] : memref<2x1024xf32, #tpu.memory_space<vmem>>, vector<2x1024xf32>
    tpu.vector_store %arg4[%c0_5, %c0_6], %8 {strides = array<i32>} : memref<2x1024xf32, #tpu.memory_space<vmem>>, vector<2x1024xf32>,
    return
  }
  func.func @transform_0(%arg0: i32, %arg1: i32) -> (i32, i32) {
    %c0_i32 = arith.constant 0 : i32
    %c0_i32_0 = arith.constant 0 : i32
    return %arg0, %c0_i32 : i32, i32
  }
  func.func @transform_1(%arg0: i32, %arg1: i32) -> (i32, i32) {
    %c0_i32 = arith.constant 0 : i32
    return %arg0, %arg1 : i32, i32
  }
  func.func @transform_2(%arg0: i32, %arg1: i32) -> (i32, i32) {
    %c0_i32 = arith.constant 0 : i32
    return %arg0, %arg1 : i32, i32
  }
}

</mosaic_0001>

<bundles_post_ra>
// kernel: tpu_custom_call.1
= control target key start
LH: loop header
LB: loop body
LE: loop exit
PB: predicated region body
PF: predicated region fallthrough
CT: control target
= control target key end

     0   :  { %7 = vsyncpa [#allocation3], 0  ;;  %s139_s0 = inlined_call_operand.vmem [shape: f32[2,1], index: 0, kind: input, shape index: {}]   ;;  %s140_s1 = inlined_call_operand.hbm [shape: f32[2,1024], index: 1, kind: input, shape index: {}]   ;;  %s141_s2 = inlined_call_operand.hbm [shape: f32[2,1024], index: 2, kind: output, shape index: {}]  }
   0x1   :  { %8 = vsyncpa [#allocation4], 0  ;;  %s110_s9 = smov [#allocation2]  }
   0x2   :  { %s17_s10 = sshll.u32 %s110_s9, 4  ;;  %s18_s10 = int_to_ptr.vmem [resolvable:$true] %s17_s10 }
   0x3   :  { %s74_s11 = scalar_lea.vmem %s18_s10, 256  ;;  %p79_p1 = scmp.lt.s32.totalorder %s18_s10, %s18_s10 }
   0x4   :  { %p75_p0 = scmp.ne.s32.totalorder %s18_s10, %s74_s11  ;;  %p80_p2 = scmp.lt.s32.totalorder %s74_s11, %s74_s11 }
   0x6   :  { %p81_p3 = por %p80_p2, %p79_p1 }
   0x8   :  { %p82_p4 = pnand %p81_p3, %p75_p0 }
   0xa   :  { %85 = shalt.err (!%p82_p4)
}
   0xb   :  { %20 = dma.hbm_to_vmem [thread:$0]  %s140_s1, 256, %s18_s10, [#allocation3]  }
   0xc   :  { %106 = dma.done.wait [#allocation3], 256  }
   0xd   :  { %107 = vsyncadd [#allocation3], 4294967040  ;;  %v111_v0 = vmov 0   ;;  %v24_v1 = vld [vmem:[%s139_s0] sm:$0x3]  ;;  %v112_v2 = vmov 0.0   ;;  %v36_v6 = vlaneseq }
   0xe   :  { %65 = vset.pattern.permute.xlu0 %v111_v0  ;;  %vm25_vm0 = vcmp.lt.f32.partialorder %v24_v1, 0.75  ;;  %v113_v4 = vmov 269488144   ;;  %v27_v10 = vld [vmem:[#allocation2] sm:$0xff]  ;;  %v28_v11 = vld [vmem:[#allocation2 + $0x8] sm:$0xff]  ;;  %s114_s1 = smov [#allocation5]  }
   0xf   :  { %v26_v3 = vsel %vm25_vm0, 1.3333334, %v112_v2  ;;  %v34_v5 = vunpack.c.l.s4 %v113_v4  ;;  %v37_v8 = vshrl.u32 %v36_v6, 7  ;;  %s51_s16 = sshll.u32 %s114_s1, 4  ;;  %s52_s16 = int_to_ptr.vmem [resolvable:$true] %s51_s16 }
  0x10   :  { %31 = vperm.xlu0 %65, %v26_v3   ;;  %s86_s0 = scalar_lea.vmem %s52_s16, 256  ;;  %p91_p6 = scmp.lt.s32.totalorder %s52_s16, %s52_s16 }
  0x11   :  { %v35_v7 = vunpack.c.0.s8 %v34_v5  ;;  %p87_p5 = scmp.ne.s32.totalorder %s52_s16, %s86_s0  ;;  %p92_p7 = scmp.lt.s32.totalorder %s86_s0, %s86_s0 }
  0x13   :  { %v38_v9 = vsub.s32 %v35_v7, %v37_v8  ;;  %p93_p8 = por %p92_p7, %p91_p6 }
  0x15   :  { %p94_p9 = pnand %p93_p8, %p87_p5 }
  0x8b   :  { %v32_v12 = vpop.permute.xlu0 %31 }
  0x8c   :  { %v39_v13 = vrot.slane %v32_v12, %v38_v9 }
  0x8e   :  { %v41_v14 = vmul.f32 %v39_v13, %v27_v10  ;;  %v42_v15 = vmul.f32 %v39_v13, %v28_v11 }
  0x90   :  { %43 = vst [vmem:[#allocation5] sm:$0xff] %v41_v14  ;;  %44 = vst [vmem:[#allocation5 + $0x8] sm:$0xff] %v42_v15 }
  0x91   :  { %97 = shalt.err (!%p94_p9)
}
  0x92   :  { %54 = dma.vmem_to_hbm [thread:$0]  %s52_s16, 256, %s141_s2, [#allocation4]  }
  0x93   :  { %108 = dma.done.wait [#allocation4], 256  }
  0x94   :  { %109 = vsyncadd [#allocation4], 4294967040 }
  0x95   :  { %58 = vsyncpa [#allocation3], 1 }
  0x96   :  { %59 = vsyncpa [#allocation4], 1 }

</bundles_post_ra>
